<compile_context>
chip_gen: v6e
topology: v6e:2x2x1
jax: 0.10.0
libtpu: 0.0.40
codegen_flags: <defaults>
</compile_context>

<pallas_src>
import functools

import jax
import jax.numpy as jnp
from jax.experimental import pallas as pl
from jax.experimental.pallas import tpu as pltpu


def gru_head_kernel(x_ref, wih_ref, whh_ref, bgi_ref, bhn_ref, wo_ref, bo_ref,
                    out_ref, gi_ref, *, seq_len):
    """Single-invocation GRU forward + max-pool + classification head.

    x_ref   : (T*Bp, E) embedded inputs, time-major rows, batch padded to 8
    wih_ref : (E, 3H)   input->hidden weights, gate order [r, z, n]
    whh_ref : (H, 3H)   hidden->hidden weights, gate order [r, z, n]
    bgi_ref : (1, 3H)   x-side bias (b_ih_r + b_hh_r, b_ih_z + b_hh_z, b_ih_n)
    bhn_ref : (1, H)    b_hh_n (cannot be folded: it sits inside r * (.))
    wo_ref  : (H, C)    classifier weight (pre-transposed)
    bo_ref  : (1, C)    classifier bias
    out_ref : (Bp, C)   log-softmax output
    gi_ref  : (T*Bp, 3H) VMEM scratch for the precomputed input projections
    """
    T = seq_len
    Bp = out_ref.shape[0]
    H = whh_ref.shape[0]

    # ---- Phase 1: input projections for all timesteps in one fused MXU pass
    # (M = T*Bp rows, N = 3H = 96 lanes) -> removes the x-side matmuls from
    # the serial critical path and writes one lane-dense scratch.
    gi_ref[...] = (jnp.dot(x_ref[...], wih_ref[...],
                           preferred_element_type=jnp.float32)
                   + bgi_ref[...])

    # ---- Loop-invariant values hoisted out of the recurrence.
    whh_cat = whh_ref[...]                                   # (H, 3H)
    bhn = jnp.broadcast_to(bhn_ref[...], (Bp, H))            # (Bp, H)

    # ---- Phase 2: serial recurrence; h and the running max live in vregs.
    # One fused (Bp,H)@(H,3H) dot per step; gates split by static lane slices
    # (gate order [r, z, n] preserved from the wrapper-side concat).
    def step(t, carry):
        h, mx = carry
        gh = jnp.dot(h, whh_cat, preferred_element_type=jnp.float32)  # (Bp,3H)
        row = pl.multiple_of(t * Bp, Bp)
        gi = gi_ref[pl.ds(row, Bp), :]                                # (Bp,3H)
        r = jax.nn.sigmoid(gi[:, :H] + gh[:, :H])
        z = jax.nn.sigmoid(gi[:, H:2 * H] + gh[:, H:2 * H])
        n = jnp.tanh(gi[:, 2 * H:] + r * (gh[:, 2 * H:] + bhn))
        h_new = (1.0 - z) * n + z * h
        return h_new, jnp.maximum(mx, h_new)

    h0 = jnp.zeros((Bp, H), jnp.float32)
    mx0 = jnp.full((Bp, H), -jnp.inf, jnp.float32)
    _, mx = jax.lax.fori_loop(0, T, step, (h0, mx0), unroll=min(T, 8))

    # ---- Phase 3: classification head (tanh -> linear -> log_softmax).
    pooled = jnp.tanh(mx)                                            # (Bp, H)
    logits = jnp.dot(pooled, wo_ref[...],
                     preferred_element_type=jnp.float32) + bo_ref[...]  # (Bp,C)
    m = jnp.max(logits, axis=1, keepdims=True)
    s = logits - m
    lse = jnp.log(jnp.sum(jnp.exp(s), axis=1, keepdims=True))
    out_ref[...] = s - lse


@jax.jit
def gru_forward(tokens, params):
    """tokens: (T, B) int32 token ids. Returns ((B, C) log-probs, kl_loss)."""
    embed_w = params["embed"]          # (V, E)
    w_ih = params["w_ih"]              # (E, 3H)  gate order [r, z, n]
    w_hh = params["w_hh"]              # (H, 3H)
    b_ih = params["b_ih"]              # (1, 3H)
    b_hh = params["b_hh"]              # (1, 3H)
    w_o = params["w_o"]                # (H, C)
    b_o = params["b_o"]                # (1, C)

    T, B = tokens.shape
    E = embed_w.shape[1]
    H = w_hh.shape[0]
    C = w_o.shape[1]

    # Pad batch to a full f32 sublane tile (8) -> no masked rows in vregs/MXU.
    Bp = max(8, -(-B // 8) * 8)

    # Glue: embedding lookup (gather) in XLA, shape (T, B, E) -> pad to Bp and
    # flatten time-major to (T*Bp, E) so the kernel never reshapes in VMEM.
    x_emb = jnp.take(embed_w, tokens, axis=0).astype(jnp.float32)
    if Bp != B:
        x_emb = jnp.pad(x_emb, ((0, 0), (0, Bp - B), (0, 0)))
    x_flat = x_emb.reshape(T * Bp, E)
    # TODO(synk): custom Dropout class (bernoulli/gaussian/variational) not
    # defined in the reference; treated as identity (eval mode).

    # Gate order [r, z, n] already contiguous in the PyTorch-style (., 3H)
    # layout -> fused weights are used as-is.  Fold b_ih (all gates) and
    # b_hh (r,z only) into the single x-side bias; keep b_hh_n separate.
    b_gi = jnp.concatenate([b_ih[:, :2 * H] + b_hh[:, :2 * H],
                            b_ih[:, 2 * H:]], axis=1)                # (1, 3H)
    b_hn = b_hh[:, 2 * H:]                                           # (1, H)

    kernel = functools.partial(gru_head_kernel, seq_len=T)
    out = pl.pallas_call(
        kernel,
        out_shape=jax.ShapeDtypeStruct((Bp, C), jnp.float32),
        grid_spec=pltpu.PrefetchScalarGridSpec(
            num_scalar_prefetch=0,
            grid=(1,),
            in_specs=[
                pl.BlockSpec((T * Bp, E), lambda i: (0, 0)),     # x (flattened)
                pl.BlockSpec((E, 3 * H), lambda i: (0, 0)),      # W_ih fused
                pl.BlockSpec((H, 3 * H), lambda i: (0, 0)),      # W_hh fused
                pl.BlockSpec((1, 3 * H), lambda i: (0, 0)),      # folded bias
                pl.BlockSpec((1, H), lambda i: (0, 0)),          # b_hh_n
                pl.BlockSpec((H, C), lambda i: (0, 0)),          # W_h2o
                pl.BlockSpec((1, C), lambda i: (0, 0)),          # b_h2o
            ],
            out_specs=pl.BlockSpec((Bp, C), lambda i: (0, 0)),
            scratch_shapes=[
                pltpu.VMEM((T * Bp, 3 * H), jnp.float32),        # gi (fused)
            ],
        ),
        compiler_params=pltpu.CompilerParams(
            dimension_semantics=("arbitrary",),
            vmem_limit_bytes=64 << 20),
    )(x_flat, w_ih, w_hh, b_gi, b_hn, w_o, b_o)

    out = out[:B]
    kl_loss = jnp.zeros((1,), dtype=jnp.float32)
    return out, kl_loss


def reference_forward(tokens, params):
    """Pure-JAX reference of the same forward pass (PyTorch GRU semantics)."""
    x = jnp.take(params["embed"], tokens, axis=0).astype(jnp.float32)  # (T,B,E)
    T, B, _ = x.shape
    H = params["w_hh"].shape[0]
    h = jnp.zeros((B, H), jnp.float32)
    outs = []
    for t in range(T):
        gi = x[t] @ params["w_ih"] + params["b_ih"]
        gh = h @ params["w_hh"] + params["b_hh"]
        i_r, i_z, i_n = gi[:, :H], gi[:, H:2 * H], gi[:, 2 * H:]
        h_r, h_z, h_n = gh[:, :H], gh[:, H:2 * H], gh[:, 2 * H:]
        r = jax.nn.sigmoid(i_r + h_r)
        z = jax.nn.sigmoid(i_z + h_z)
        n = jnp.tanh(i_n + r * h_n)
        h = (1.0 - z) * n + z * h
        outs.append(h)
    out = jnp.stack(outs, axis=0)                 # (T, B, H)
    pooled = jnp.max(out, axis=0)                 # max_pool1d over seq -> (B, H)
    pooled = jnp.tanh(pooled)
    logits = pooled @ params["w_o"] + params["b_o"]
    return jax.nn.log_softmax(logits, axis=1)


def init_params(key, vocab_size, embed_dim, hidden_dim, num_class, padding_id):
    ks = jax.random.split(key, 8)
    k = 1.0 / jnp.sqrt(hidden_dim)
    embed = jax.random.uniform(ks[0], (vocab_size, embed_dim), jnp.float32)
    embed = embed.at[padding_id].set(0.0)  # padding_idx row zeroed
    params = {
        "embed": embed,
        "w_ih": jax.random.uniform(ks[1], (embed_dim, 3 * hidden_dim),
                                   jnp.float32, -k, k),
        "w_hh": jax.random.uniform(ks[2], (hidden_dim, 3 * hidden_dim),
                                   jnp.float32, -k, k),
        "b_ih": jax.random.uniform(ks[3], (1, 3 * hidden_dim),
                                   jnp.float32, -k, k),
        "b_hh": jax.random.uniform(ks[4], (1, 3 * hidden_dim),
                                   jnp.float32, -k, k),
        "w_o": jax.random.uniform(ks[5], (hidden_dim, num_class),
                                  jnp.float32, -k, k),
        "b_o": jax.random.uniform(ks[6], (1, num_class),
                                  jnp.float32, -k, k),
    }
    return params


if __name__ == "__main__":
    # Small config: unidirectional, single-layer GRU classifier.
    SEQ, BATCH = 8, 2
    VOCAB, EMBED, HIDDEN, NUM_CLASS = 50, 16, 32, 4
    PADDING_ID = 0

    key = jax.random.PRNGKey(0)
    k_tok, k_par = jax.random.split(key)
    params = init_params(k_par, VOCAB, EMBED, HIDDEN, NUM_CLASS, PADDING_ID)
    tokens = jax.random.randint(k_tok, (SEQ, BATCH), 0, VOCAB, dtype=jnp.int32)

    out, kl = gru_forward(tokens, params)
    out = jax.block_until_ready(out)

    ref = reference_forward(tokens, params)
    assert out.shape == (BATCH, NUM_CLASS)
    assert jnp.allclose(out, ref, atol=1e-5, rtol=1e-5), (out, ref)
    print("KERNEL_OK")
</pallas_src>

<mosaic_0001>
module attributes {stable_mosaic.version = 11 : i64} {
  func.func @gru_head_kernel(%arg0: i32, %arg1: memref<64x16xf32, #tpu.memory_space<vmem>>, %arg2: memref<16x96xf32, #tpu.memory_space<vmem>>, %arg3: memref<32x96xf32, #tpu.memory_space<vmem>>, %arg4: memref<1x96xf32, #tpu.memory_space<vmem>>, %arg5: memref<1x32xf32, #tpu.memory_space<vmem>>, %arg6: memref<32x4xf32, #tpu.memory_space<vmem>>, %arg7: memref<1x4xf32, #tpu.memory_space<vmem>>, %arg8: memref<8x4xf32, #tpu.memory_space<vmem>>, %arg9: memref<64x96xf32, #tpu.memory_space<vmem>>) attributes {dimension_semantics = [#tpu.dimension_semantics<arbitrary>], iteration_bounds = array<i64: 1>, scalar_prefetch = 0 : i64, scratch_operands = 1 : i64, tpu.core_type = #tpu.core_type<tc>, window_params = [{pipeline_mode = #tpu.pipeline_mode<synchronous>, transform_indices = @transform_0, window_bounds = array<i64: 64, 16>}, {pipeline_mode = #tpu.pipeline_mode<synchronous>, transform_indices = @transform_1, window_bounds = array<i64: 16, 96>}, {pipeline_mode = #tpu.pipeline_mode<synchronous>, transform_indices = @transform_2, window_bounds = array<i64: 32, 96>}, {pipeline_mode = #tpu.pipeline_mode<synchronous>, transform_indices = @transform_3, window_bounds = array<i64: 1, 96>}, {pipeline_mode = #tpu.pipeline_mode<synchronous>, transform_indices = @transform_4, window_bounds = array<i64: 1, 32>}, {pipeline_mode = #tpu.pipeline_mode<synchronous>, transform_indices = @transform_5, window_bounds = array<i64: 32, 4>}, {pipeline_mode = #tpu.pipeline_mode<synchronous>, transform_indices = @transform_6, window_bounds = array<i64: 1, 4>}, {pipeline_mode = #tpu.pipeline_mode<synchronous>, transform_indices = @transform_7, window_bounds = array<i64: 8, 4>}]} {
    %c0 = arith.constant 0 : index
    %c0_0 = arith.constant 0 : index
    %0 = vector.load %arg1[%c0, %c0_0] : memref<64x16xf32, #tpu.memory_space<vmem>>, vector<64x16xf32>
    %c0_1 = arith.constant 0 : index
    %c0_2 = arith.constant 0 : index
    %1 = vector.load %arg2[%c0_1, %c0_2] : memref<16x96xf32, #tpu.memory_space<vmem>>, vector<16x96xf32>
    %cst = arith.constant dense<0.000000e+00> : vector<64x96xf32>
    %2 = tpu.matmul %0, %1, %cst {dimension_numbers = #tpu.dot_dimension_numbers<[1], [0], [0], [1], [0, 0, 1, 1], [], []>} : vector<64x16xf32>, vector<16x96xf32>, vector<64x96xf32> -> vector<64x96xf32>
    %c0_3 = arith.constant 0 : index
    %c0_4 = arith.constant 0 : index
    %3 = vector.load %arg4[%c0_3, %c0_4] : memref<1x96xf32, #tpu.memory_space<vmem>>, vector<1x96xf32>
    %4 = vector.broadcast %3 : vector<1x96xf32> to vector<64x96xf32>
    %5 = arith.addf %2, %4 : vector<64x96xf32>
    %c0_5 = arith.constant 0 : index
    %c0_6 = arith.constant 0 : index
    %6 = vector.load %arg9[%c0_5, %c0_6] : memref<64x96xf32, #tpu.memory_space<vmem>>, vector<64x96xf32>
    tpu.vector_store %arg9[%c0_5, %c0_6], %5 {strides = array<i32>} : memref<64x96xf32, #tpu.memory_space<vmem>>, vector<64x96xf32>,
    %c0_7 = arith.constant 0 : index
    %c0_8 = arith.constant 0 : index
    %7 = vector.load %arg3[%c0_7, %c0_8] : memref<32x96xf32, #tpu.memory_space<vmem>>, vector<32x96xf32>
    %c0_9 = arith.constant 0 : index
    %c0_10 = arith.constant 0 : index
    %8 = vector.load %arg5[%c0_9, %c0_10] : memref<1x32xf32, #tpu.memory_space<vmem>>, vector<1x32xf32>
    %9 = vector.shape_cast %8 : vector<1x32xf32> to vector<1x32xf32>
    %10 = vector.broadcast %9 : vector<1x32xf32> to vector<8x32xf32>
    %cst_11 = arith.constant 0.000000e+00 : f32
    %11 = vector.broadcast %cst_11 : f32 to vector<8x32xf32>
    %cst_12 = arith.constant 0xFF800000 : f32
    %12 = vector.broadcast %cst_12 : f32 to vector<8x32xf32>
    %c0_i32 = arith.constant 0 : i32
    %cst_13 = arith.constant dense<0.000000e+00> : vector<8x96xf32>
    %13 = tpu.matmul %11, %7, %cst_13 {dimension_numbers = #tpu.dot_dimension_numbers<[1], [0], [0], [1], [0, 0, 1, 1], [], []>} : vector<8x32xf32>, vector<32x96xf32>, vector<8x96xf32> -> vector<8x96xf32>
    %c8_i32 = arith.constant 8 : i32
    %14 = arith.muli %c0_i32, %c8_i32 : i32
    %15 = tpu.assume_multiple %14, 8 : i32
    %16 = arith.index_cast %15 : i32 to index
    %c0_14 = arith.constant 0 : index
    %17 = vector.load %arg9[%16, %c0_14] : memref<64x96xf32, #tpu.memory_space<vmem>>, vector<8x96xf32>
    %18 = vector.extract_strided_slice %17 {offsets = [0, 0], sizes = [8, 32], strides = [1, 1]} : vector<8x96xf32> to vector<8x32xf32>
    %19 = vector.extract_strided_slice %13 {offsets = [0, 0], sizes = [8, 32], strides = [1, 1]} : vector<8x96xf32> to vector<8x32xf32>
    %20 = arith.addf %18, %19 : vector<8x32xf32>
    %21 = arith.negf %20 : vector<8x32xf32>
    %22 = math.exp %21 : vector<8x32xf32>
    %cst_15 = arith.constant 1.000000e+00 : f32
    %23 = vector.broadcast %cst_15 : f32 to vector<8x32xf32>
    %24 = arith.addf %23, %22 : vector<8x32xf32>
    %25 = arith.divf %23, %24 : vector<8x32xf32>
    %26 = vector.extract_strided_slice %17 {offsets = [0, 32], sizes = [8, 32], strides = [1, 1]} : vector<8x96xf32> to vector<8x32xf32>
    %27 = vector.extract_strided_slice %13 {offsets = [0, 32], sizes = [8, 32], strides = [1, 1]} : vector<8x96xf32> to vector<8x32xf32>
    %28 = arith.addf %26, %27 : vector<8x32xf32>
    %29 = arith.negf %28 : vector<8x32xf32>
    %30 = math.exp %29 : vector<8x32xf32>
    %cst_16 = arith.constant 1.000000e+00 : f32
    %31 = vector.broadcast %cst_16 : f32 to vector<8x32xf32>
    %32 = arith.addf %31, %30 : vector<8x32xf32>
    %33 = arith.divf %31, %32 : vector<8x32xf32>
    %34 = vector.extract_strided_slice %17 {offsets = [0, 64], sizes = [8, 32], strides = [1, 1]} : vector<8x96xf32> to vector<8x32xf32>
    %35 = vector.extract_strided_slice %13 {offsets = [0, 64], sizes = [8, 32], strides = [1, 1]} : vector<8x96xf32> to vector<8x32xf32>
    %36 = arith.addf %35, %10 : vector<8x32xf32>
    %37 = arith.mulf %25, %36 : vector<8x32xf32>
    %38 = arith.addf %34, %37 : vector<8x32xf32>
    %39 = math.tanh %38 : vector<8x32xf32>
    %cst_17 = arith.constant 1.000000e+00 : f32
    %40 = vector.broadcast %cst_17 : f32 to vector<8x32xf32>
    %41 = arith.subf %40, %33 : vector<8x32xf32>
    %42 = arith.mulf %41, %39 : vector<8x32xf32>
    %43 = arith.mulf %33, %11 : vector<8x32xf32>
    %44 = arith.addf %42, %43 : vector<8x32xf32>
    %45 = arith.maximumf %12, %44 : vector<8x32xf32>
    %c1_i32 = arith.constant 1 : i32
    %cst_18 = arith.constant dense<0.000000e+00> : vector<8x96xf32>
    %46 = tpu.matmul %44, %7, %cst_18 {dimension_numbers = #tpu.dot_dimension_numbers<[1], [0], [0], [1], [0, 0, 1, 1], [], []>} : vector<8x32xf32>, vector<32x96xf32>, vector<8x96xf32> -> vector<8x96xf32>
    %c8_i32_19 = arith.constant 8 : i32
    %47 = arith.muli %c1_i32, %c8_i32_19 : i32
    %48 = tpu.assume_multiple %47, 8 : i32
    %49 = arith.index_cast %48 : i32 to index
    %c0_20 = arith.constant 0 : index
    %50 = vector.load %arg9[%49, %c0_20] : memref<64x96xf32, #tpu.memory_space<vmem>>, vector<8x96xf32>
    %51 = vector.extract_strided_slice %50 {offsets = [0, 0], sizes = [8, 32], strides = [1, 1]} : vector<8x96xf32> to vector<8x32xf32>
    %52 = vector.extract_strided_slice %46 {offsets = [0, 0], sizes = [8, 32], strides = [1, 1]} : vector<8x96xf32> to vector<8x32xf32>
    %53 = arith.addf %51, %52 : vector<8x32xf32>
    %54 = arith.negf %53 : vector<8x32xf32>
    %55 = math.exp %54 : vector<8x32xf32>
    %cst_21 = arith.constant 1.000000e+00 : f32
    %56 = vector.broadcast %cst_21 : f32 to vector<8x32xf32>
    %57 = arith.addf %56, %55 : vector<8x32xf32>
    %58 = arith.divf %56, %57 : vector<8x32xf32>
    %59 = vector.extract_strided_slice %50 {offsets = [0, 32], sizes = [8, 32], strides = [1, 1]} : vector<8x96xf32> to vector<8x32xf32>
    %60 = vector.extract_strided_slice %46 {offsets = [0, 32], sizes = [8, 32], strides = [1, 1]} : vector<8x96xf32> to vector<8x32xf32>
    %61 = arith.addf %59, %60 : vector<8x32xf32>
    %62 = arith.negf %61 : vector<8x32xf32>
    %63 = math.exp %62 : vector<8x32xf32>
    %cst_22 = arith.constant 1.000000e+00 : f32
    %64 = vector.broadcast %cst_22 : f32 to vector<8x32xf32>
    %65 = arith.addf %64, %63 : vector<8x32xf32>
    %66 = arith.divf %64, %65 : vector<8x32xf32>
    %67 = vector.extract_strided_slice %50 {offsets = [0, 64], sizes = [8, 32], strides = [1, 1]} : vector<8x96xf32> to vector<8x32xf32>
    %68 = vector.extract_strided_slice %46 {offsets = [0, 64], sizes = [8, 32], strides = [1, 1]} : vector<8x96xf32> to vector<8x32xf32>
    %69 = arith.addf %68, %10 : vector<8x32xf32>
    %70 = arith.mulf %58, %69 : vector<8x32xf32>
    %71 = arith.addf %67, %70 : vector<8x32xf32>
    %72 = math.tanh %71 : vector<8x32xf32>
    %cst_23 = arith.constant 1.000000e+00 : f32
    %73 = vector.broadcast %cst_23 : f32 to vector<8x32xf32>
    %74 = arith.subf %73, %66 : vector<8x32xf32>
    %75 = arith.mulf %74, %72 : vector<8x32xf32>
    %76 = arith.mulf %66, %44 : vector<8x32xf32>
    %77 = arith.addf %75, %76 : vector<8x32xf32>
    %78 = arith.maximumf %45, %77 : vector<8x32xf32>
    %c2_i32 = arith.constant 2 : i32
    %cst_24 = arith.constant dense<0.000000e+00> : vector<8x96xf32>
    %79 = tpu.matmul %77, %7, %cst_24 {dimension_numbers = #tpu.dot_dimension_numbers<[1], [0], [0], [1], [0, 0, 1, 1], [], []>} : vector<8x32xf32>, vector<32x96xf32>, vector<8x96xf32> -> vector<8x96xf32>
    %c8_i32_25 = arith.constant 8 : i32
    %80 = arith.muli %c2_i32, %c8_i32_25 : i32
    %81 = tpu.assume_multiple %80, 8 : i32
    %82 = arith.index_cast %81 : i32 to index
    %c0_26 = arith.constant 0 : index
    %83 = vector.load %arg9[%82, %c0_26] : memref<64x96xf32, #tpu.memory_space<vmem>>, vector<8x96xf32>
    %84 = vector.extract_strided_slice %83 {offsets = [0, 0], sizes = [8, 32], strides = [1, 1]} : vector<8x96xf32> to vector<8x32xf32>
    %85 = vector.extract_strided_slice %79 {offsets = [0, 0], sizes = [8, 32], strides = [1, 1]} : vector<8x96xf32> to vector<8x32xf32>
    %86 = arith.addf %84, %85 : vector<8x32xf32>
    %87 = arith.negf %86 : vector<8x32xf32>
    %88 = math.exp %87 : vector<8x32xf32>
    %cst_27 = arith.constant 1.000000e+00 : f32
    %89 = vector.broadcast %cst_27 : f32 to vector<8x32xf32>
    %90 = arith.addf %89, %88 : vector<8x32xf32>
    %91 = arith.divf %89, %90 : vector<8x32xf32>
    %92 = vector.extract_strided_slice %83 {offsets = [0, 32], sizes = [8, 32], strides = [1, 1]} : vector<8x96xf32> to vector<8x32xf32>
    %93 = vector.extract_strided_slice %79 {offsets = [0, 32], sizes = [8, 32], strides = [1, 1]} : vector<8x96xf32> to vector<8x32xf32>
    %94 = arith.addf %92, %93 : vector<8x32xf32>
    %95 = arith.negf %94 : vector<8x32xf32>
    %96 = math.exp %95 : vector<8x32xf32>
    %cst_28 = arith.constant 1.000000e+00 : f32
    %97 = vector.broadcast %cst_28 : f32 to vector<8x32xf32>
    %98 = arith.addf %97, %96 : vector<8x32xf32>
    %99 = arith.divf %97, %98 : vector<8x32xf32>
    %100 = vector.extract_strided_slice %83 {offsets = [0, 64], sizes = [8, 32], strides = [1, 1]} : vector<8x96xf32> to vector<8x32xf32>
    %101 = vector.extract_strided_slice %79 {offsets = [0, 64], sizes = [8, 32], strides = [1, 1]} : vector<8x96xf32> to vector<8x32xf32>
    %102 = arith.addf %101, %10 : vector<8x32xf32>
    %103 = arith.mulf %91, %102 : vector<8x32xf32>
    %104 = arith.addf %100, %103 : vector<8x32xf32>
    %105 = math.tanh %104 : vector<8x32xf32>
    %cst_29 = arith.constant 1.000000e+00 : f32
    %106 = vector.broadcast %cst_29 : f32 to vector<8x32xf32>
    %107 = arith.subf %106, %99 : vector<8x32xf32>
    %108 = arith.mulf %107, %105 : vector<8x32xf32>
    %109 = arith.mulf %99, %77 : vector<8x32xf32>
    %110 = arith.addf %108, %109 : vector<8x32xf32>
    %111 = arith.maximumf %78, %110 : vector<8x32xf32>
    %c3_i32 = arith.constant 3 : i32
    %cst_30 = arith.constant dense<0.000000e+00> : vector<8x96xf32>
    %112 = tpu.matmul %110, %7, %cst_30 {dimension_numbers = #tpu.dot_dimension_numbers<[1], [0], [0], [1], [0, 0, 1, 1], [], []>} : vector<8x32xf32>, vector<32x96xf32>, vector<8x96xf32> -> vector<8x96xf32>
    %c8_i32_31 = arith.constant 8 : i32
    %113 = arith.muli %c3_i32, %c8_i32_31 : i32
    %114 = tpu.assume_multiple %113, 8 : i32
    %115 = arith.index_cast %114 : i32 to index
    %c0_32 = arith.constant 0 : index
    %116 = vector.load %arg9[%115, %c0_32] : memref<64x96xf32, #tpu.memory_space<vmem>>, vector<8x96xf32>
    %117 = vector.extract_strided_slice %116 {offsets = [0, 0], sizes = [8, 32], strides = [1, 1]} : vector<8x96xf32> to vector<8x32xf32>
    %118 = vector.extract_strided_slice %112 {offsets = [0, 0], sizes = [8, 32], strides = [1, 1]} : vector<8x96xf32> to vector<8x32xf32>
    %119 = arith.addf %117, %118 : vector<8x32xf32>
    %120 = arith.negf %119 : vector<8x32xf32>
    %121 = math.exp %120 : vector<8x32xf32>
    %cst_33 = arith.constant 1.000000e+00 : f32
    %122 = vector.broadcast %cst_33 : f32 to vector<8x32xf32>
    %123 = arith.addf %122, %121 : vector<8x32xf32>
    %124 = arith.divf %122, %123 : vector<8x32xf32>
    %125 = vector.extract_strided_slice %116 {offsets = [0, 32], sizes = [8, 32], strides = [1, 1]} : vector<8x96xf32> to vector<8x32xf32>
    %126 = vector.extract_strided_slice %112 {offsets = [0, 32], sizes = [8, 32], strides = [1, 1]} : vector<8x96xf32> to vector<8x32xf32>
    %127 = arith.addf %125, %126 : vector<8x32xf32>
    %128 = arith.negf %127 : vector<8x32xf32>
    %129 = math.exp %128 : vector<8x32xf32>
    %cst_34 = arith.constant 1.000000e+00 : f32
    %130 = vector.broadcast %cst_34 : f32 to vector<8x32xf32>
    %131 = arith.addf %130, %129 : vector<8x32xf32>
    %132 = arith.divf %130, %131 : vector<8x32xf32>
    %133 = vector.extract_strided_slice %116 {offsets = [0, 64], sizes = [8, 32], strides = [1, 1]} : vector<8x96xf32> to vector<8x32xf32>
    %134 = vector.extract_strided_slice %112 {offsets = [0, 64], sizes = [8, 32], strides = [1, 1]} : vector<8x96xf32> to vector<8x32xf32>
    %135 = arith.addf %134, %10 : vector<8x32xf32>
    %136 = arith.mulf %124, %135 : vector<8x32xf32>
    %137 = arith.addf %133, %136 : vector<8x32xf32>
    %138 = math.tanh %137 : vector<8x32xf32>
    %cst_35 = arith.constant 1.000000e+00 : f32
    %139 = vector.broadcast %cst_35 : f32 to vector<8x32xf32>
    %140 = arith.subf %139, %132 : vector<8x32xf32>
    %141 = arith.mulf %140, %138 : vector<8x32xf32>
    %142 = arith.mulf %132, %110 : vector<8x32xf32>
    %143 = arith.addf %141, %142 : vector<8x32xf32>
    %144 = arith.maximumf %111, %143 : vector<8x32xf32>
    %c4_i32 = arith.constant 4 : i32
    %cst_36 = arith.constant dense<0.000000e+00> : vector<8x96xf32>
    %145 = tpu.matmul %143, %7, %cst_36 {dimension_numbers = #tpu.dot_dimension_numbers<[1], [0], [0], [1], [0, 0, 1, 1], [], []>} : vector<8x32xf32>, vector<32x96xf32>, vector<8x96xf32> -> vector<8x96xf32>
    %c8_i32_37 = arith.constant 8 : i32
    %146 = arith.muli %c4_i32, %c8_i32_37 : i32
    %147 = tpu.assume_multiple %146, 8 : i32
    %148 = arith.index_cast %147 : i32 to index
    %c0_38 = arith.constant 0 : index
    %149 = vector.load %arg9[%148, %c0_38] : memref<64x96xf32, #tpu.memory_space<vmem>>, vector<8x96xf32>
    %150 = vector.extract_strided_slice %149 {offsets = [0, 0], sizes = [8, 32], strides = [1, 1]} : vector<8x96xf32> to vector<8x32xf32>
    %151 = vector.extract_strided_slice %145 {offsets = [0, 0], sizes = [8, 32], strides = [1, 1]} : vector<8x96xf32> to vector<8x32xf32>
    %152 = arith.addf %150, %151 : vector<8x32xf32>
    %153 = arith.negf %152 : vector<8x32xf32>
    %154 = math.exp %153 : vector<8x32xf32>
    %cst_39 = arith.constant 1.000000e+00 : f32
    %155 = vector.broadcast %cst_39 : f32 to vector<8x32xf32>
    %156 = arith.addf %155, %154 : vector<8x32xf32>
    %157 = arith.divf %155, %156 : vector<8x32xf32>
    %158 = vector.extract_strided_slice %149 {offsets = [0, 32], sizes = [8, 32], strides = [1, 1]} : vector<8x96xf32> to vector<8x32xf32>
    %159 = vector.extract_strided_slice %145 {offsets = [0, 32], sizes = [8, 32], strides = [1, 1]} : vector<8x96xf32> to vector<8x32xf32>
    %160 = arith.addf %158, %159 : vector<8x32xf32>
    %161 = arith.negf %160 : vector<8x32xf32>
    %162 = math.exp %161 : vector<8x32xf32>
    %cst_40 = arith.constant 1.000000e+00 : f32
    %163 = vector.broadcast %cst_40 : f32 to vector<8x32xf32>
    %164 = arith.addf %163, %162 : vector<8x32xf32>
    %165 = arith.divf %163, %164 : vector<8x32xf32>
    %166 = vector.extract_strided_slice %149 {offsets = [0, 64], sizes = [8, 32], strides = [1, 1]} : vector<8x96xf32> to vector<8x32xf32>
    %167 = vector.extract_strided_slice %145 {offsets = [0, 64], sizes = [8, 32], strides = [1, 1]} : vector<8x96xf32> to vector<8x32xf32>
    %168 = arith.addf %167, %10 : vector<8x32xf32>
    %169 = arith.mulf %157, %168 : vector<8x32xf32>
    %170 = arith.addf %166, %169 : vector<8x32xf32>
    %171 = math.tanh %170 : vector<8x32xf32>
    %cst_41 = arith.constant 1.000000e+00 : f32
    %172 = vector.broadcast %cst_41 : f32 to vector<8x32xf32>
    %173 = arith.subf %172, %165 : vector<8x32xf32>
    %174 = arith.mulf %173, %171 : vector<8x32xf32>
    %175 = arith.mulf %165, %143 : vector<8x32xf32>
    %176 = arith.addf %174, %175 : vector<8x32xf32>
    %177 = arith.maximumf %144, %176 : vector<8x32xf32>
    %c5_i32 = arith.constant 5 : i32
    %cst_42 = arith.constant dense<0.000000e+00> : vector<8x96xf32>
    %178 = tpu.matmul %176, %7, %cst_42 {dimension_numbers = #tpu.dot_dimension_numbers<[1], [0], [0], [1], [0, 0, 1, 1], [], []>} : vector<8x32xf32>, vector<32x96xf32>, vector<8x96xf32> -> vector<8x96xf32>
    %c8_i32_43 = arith.constant 8 : i32
    %179 = arith.muli %c5_i32, %c8_i32_43 : i32
    %180 = tpu.assume_multiple %179, 8 : i32
    %181 = arith.index_cast %180 : i32 to index
    %c0_44 = arith.constant 0 : index
    %182 = vector.load %arg9[%181, %c0_44] : memref<64x96xf32, #tpu.memory_space<vmem>>, vector<8x96xf32>
    %183 = vector.extract_strided_slice %182 {offsets = [0, 0], sizes = [8, 32], strides = [1, 1]} : vector<8x96xf32> to vector<8x32xf32>
    %184 = vector.extract_strided_slice %178 {offsets = [0, 0], sizes = [8, 32], strides = [1, 1]} : vector<8x96xf32> to vector<8x32xf32>
    %185 = arith.addf %183, %184 : vector<8x32xf32>
    %186 = arith.negf %185 : vector<8x32xf32>
    %187 = math.exp %186 : vector<8x32xf32>
    %cst_45 = arith.constant 1.000000e+00 : f32
    %188 = vector.broadcast %cst_45 : f32 to vector<8x32xf32>
    %189 = arith.addf %188, %187 : vector<8x32xf32>
    %190 = arith.divf %188, %189 : vector<8x32xf32>
    %191 = vector.extract_strided_slice %182 {offsets = [0, 32], sizes = [8, 32], strides = [1, 1]} : vector<8x96xf32> to vector<8x32xf32>
    %192 = vector.extract_strided_slice %178 {offsets = [0, 32], sizes = [8, 32], strides = [1, 1]} : vector<8x96xf32> to vector<8x32xf32>
    %193 = arith.addf %191, %192 : vector<8x32xf32>
    %194 = arith.negf %193 : vector<8x32xf32>
    %195 = math.exp %194 : vector<8x32xf32>
    %cst_46 = arith.constant 1.000000e+00 : f32
    %196 = vector.broadcast %cst_46 : f32 to vector<8x32xf32>
    %197 = arith.addf %196, %195 : vector<8x32xf32>
    %198 = arith.divf %196, %197 : vector<8x32xf32>
    %199 = vector.extract_strided_slice %182 {offsets = [0, 64], sizes = [8, 32], strides = [1, 1]} : vector<8x96xf32> to vector<8x32xf32>
    %200 = vector.extract_strided_slice %178 {offsets = [0, 64], sizes = [8, 32], strides = [1, 1]} : vector<8x96xf32> to vector<8x32xf32>
    %201 = arith.addf %200, %10 : vector<8x32xf32>
    %202 = arith.mulf %190, %201 : vector<8x32xf32>
    %203 = arith.addf %199, %202 : vector<8x32xf32>
    %204 = math.tanh %203 : vector<8x32xf32>
    %cst_47 = arith.constant 1.000000e+00 : f32
    %205 = vector.broadcast %cst_47 : f32 to vector<8x32xf32>
    %206 = arith.subf %205, %198 : vector<8x32xf32>
    %207 = arith.mulf %206, %204 : vector<8x32xf32>
    %208 = arith.mulf %198, %176 : vector<8x32xf32>
    %209 = arith.addf %207, %208 : vector<8x32xf32>
    %210 = arith.maximumf %177, %209 : vector<8x32xf32>
    %c6_i32 = arith.constant 6 : i32
    %cst_48 = arith.constant dense<0.000000e+00> : vector<8x96xf32>
    %211 = tpu.matmul %209, %7, %cst_48 {dimension_numbers = #tpu.dot_dimension_numbers<[1], [0], [0], [1], [0, 0, 1, 1], [], []>} : vector<8x32xf32>, vector<32x96xf32>, vector<8x96xf32> -> vector<8x96xf32>
    %c8_i32_49 = arith.constant 8 : i32
    %212 = arith.muli %c6_i32, %c8_i32_49 : i32
    %213 = tpu.assume_multiple %212, 8 : i32
    %214 = arith.index_cast %213 : i32 to index
    %c0_50 = arith.constant 0 : index
    %215 = vector.load %arg9[%214, %c0_50] : memref<64x96xf32, #tpu.memory_space<vmem>>, vector<8x96xf32>
    %216 = vector.extract_strided_slice %215 {offsets = [0, 0], sizes = [8, 32], strides = [1, 1]} : vector<8x96xf32> to vector<8x32xf32>
    %217 = vector.extract_strided_slice %211 {offsets = [0, 0], sizes = [8, 32], strides = [1, 1]} : vector<8x96xf32> to vector<8x32xf32>
    %218 = arith.addf %216, %217 : vector<8x32xf32>
    %219 = arith.negf %218 : vector<8x32xf32>
    %220 = math.exp %219 : vector<8x32xf32>
    %cst_51 = arith.constant 1.000000e+00 : f32
    %221 = vector.broadcast %cst_51 : f32 to vector<8x32xf32>
    %222 = arith.addf %221, %220 : vector<8x32xf32>
    %223 = arith.divf %221, %222 : vector<8x32xf32>
    %224 = vector.extract_strided_slice %215 {offsets = [0, 32], sizes = [8, 32], strides = [1, 1]} : vector<8x96xf32> to vector<8x32xf32>
    %225 = vector.extract_strided_slice %211 {offsets = [0, 32], sizes = [8, 32], strides = [1, 1]} : vector<8x96xf32> to vector<8x32xf32>
    %226 = arith.addf %224, %225 : vector<8x32xf32>
    %227 = arith.negf %226 : vector<8x32xf32>
    %228 = math.exp %227 : vector<8x32xf32>
    %cst_52 = arith.constant 1.000000e+00 : f32
    %229 = vector.broadcast %cst_52 : f32 to vector<8x32xf32>
    %230 = arith.addf %229, %228 : vector<8x32xf32>
    %231 = arith.divf %229, %230 : vector<8x32xf32>
    %232 = vector.extract_strided_slice %215 {offsets = [0, 64], sizes = [8, 32], strides = [1, 1]} : vector<8x96xf32> to vector<8x32xf32>
    %233 = vector.extract_strided_slice %211 {offsets = [0, 64], sizes = [8, 32], strides = [1, 1]} : vector<8x96xf32> to vector<8x32xf32>
    %234 = arith.addf %233, %10 : vector<8x32xf32>
    %235 = arith.mulf %223, %234 : vector<8x32xf32>
    %236 = arith.addf %232, %235 : vector<8x32xf32>
    %237 = math.tanh %236 : vector<8x32xf32>
    %cst_53 = arith.constant 1.000000e+00 : f32
    %238 = vector.broadcast %cst_53 : f32 to vector<8x32xf32>
    %239 = arith.subf %238, %231 : vector<8x32xf32>
    %240 = arith.mulf %239, %237 : vector<8x32xf32>
    %241 = arith.mulf %231, %209 : vector<8x32xf32>
    %242 = arith.addf %240, %241 : vector<8x32xf32>
    %243 = arith.maximumf %210, %242 : vector<8x32xf32>
    %c7_i32 = arith.constant 7 : i32
    %cst_54 = arith.constant dense<0.000000e+00> : vector<8x96xf32>
    %244 = tpu.matmul %242, %7, %cst_54 {dimension_numbers = #tpu.dot_dimension_numbers<[1], [0], [0], [1], [0, 0, 1, 1], [], []>} : vector<8x32xf32>, vector<32x96xf32>, vector<8x96xf32> -> vector<8x96xf32>
    %c8_i32_55 = arith.constant 8 : i32
    %245 = arith.muli %c7_i32, %c8_i32_55 : i32
    %246 = tpu.assume_multiple %245, 8 : i32
    %247 = arith.index_cast %246 : i32 to index
    %c0_56 = arith.constant 0 : index
    %248 = vector.load %arg9[%247, %c0_56] : memref<64x96xf32, #tpu.memory_space<vmem>>, vector<8x96xf32>
    %249 = vector.extract_strided_slice %248 {offsets = [0, 0], sizes = [8, 32], strides = [1, 1]} : vector<8x96xf32> to vector<8x32xf32>
    %250 = vector.extract_strided_slice %244 {offsets = [0, 0], sizes = [8, 32], strides = [1, 1]} : vector<8x96xf32> to vector<8x32xf32>
    %251 = arith.addf %249, %250 : vector<8x32xf32>
    %252 = arith.negf %251 : vector<8x32xf32>
    %253 = math.exp %252 : vector<8x32xf32>
    %cst_57 = arith.constant 1.000000e+00 : f32
    %254 = vector.broadcast %cst_57 : f32 to vector<8x32xf32>
    %255 = arith.addf %254, %253 : vector<8x32xf32>
    %256 = arith.divf %254, %255 : vector<8x32xf32>
    %257 = vector.extract_strided_slice %248 {offsets = [0, 32], sizes = [8, 32], strides = [1, 1]} : vector<8x96xf32> to vector<8x32xf32>
    %258 = vector.extract_strided_slice %244 {offsets = [0, 32], sizes = [8, 32], strides = [1, 1]} : vector<8x96xf32> to vector<8x32xf32>
    %259 = arith.addf %257, %258 : vector<8x32xf32>
    %260 = arith.negf %259 : vector<8x32xf32>
    %261 = math.exp %260 : vector<8x32xf32>
    %cst_58 = arith.constant 1.000000e+00 : f32
    %262 = vector.broadcast %cst_58 : f32 to vector<8x32xf32>
    %263 = arith.addf %262, %261 : vector<8x32xf32>
    %264 = arith.divf %262, %263 : vector<8x32xf32>
    %265 = vector.extract_strided_slice %248 {offsets = [0, 64], sizes = [8, 32], strides = [1, 1]} : vector<8x96xf32> to vector<8x32xf32>
    %266 = vector.extract_strided_slice %244 {offsets = [0, 64], sizes = [8, 32], strides = [1, 1]} : vector<8x96xf32> to vector<8x32xf32>
    %267 = arith.addf %266, %10 : vector<8x32xf32>
    %268 = arith.mulf %256, %267 : vector<8x32xf32>
    %269 = arith.addf %265, %268 : vector<8x32xf32>
    %270 = math.tanh %269 : vector<8x32xf32>
    %cst_59 = arith.constant 1.000000e+00 : f32
    %271 = vector.broadcast %cst_59 : f32 to vector<8x32xf32>
    %272 = arith.subf %271, %264 : vector<8x32xf32>
    %273 = arith.mulf %272, %270 : vector<8x32xf32>
    %274 = arith.mulf %264, %242 : vector<8x32xf32>
    %275 = arith.addf %273, %274 : vector<8x32xf32>
    %276 = arith.maximumf %243, %275 : vector<8x32xf32>
    %c8_i32_60 = arith.constant 8 : i32
    %277 = math.tanh %276 : vector<8x32xf32>
    %c0_61 = arith.constant 0 : index
    %c0_62 = arith.constant 0 : index
    %278 = vector.load %arg6[%c0_61, %c0_62] : memref<32x4xf32, #tpu.memory_space<vmem>>, vector<32x4xf32>
    %cst_63 = arith.constant dense<0.000000e+00> : vector<8x4xf32>
    %279 = tpu.matmul %277, %278, %cst_63 {dimension_numbers = #tpu.dot_dimension_numbers<[1], [0], [0], [1], [0, 0, 1, 1], [], []>} : vector<8x32xf32>, vector<32x4xf32>, vector<8x4xf32> -> vector<8x4xf32>
    %c0_64 = arith.constant 0 : index
    %c0_65 = arith.constant 0 : index
    %280 = vector.load %arg7[%c0_64, %c0_65] : memref<1x4xf32, #tpu.memory_space<vmem>>, vector<1x4xf32>
    %281 = vector.broadcast %280 : vector<1x4xf32> to vector<8x4xf32>
    %282 = arith.addf %279, %281 : vector<8x4xf32>
    %cst_66 = arith.constant dense<0xFF800000> : vector<8xf32>
    %283 = vector.multi_reduction <maximumf>, %282, %cst_66 [1] : vector<8x4xf32> to vector<8xf32>
    %284 = vector.shape_cast %283 : vector<8xf32> to vector<8x1xf32>
    %285 = vector.broadcast %284 : vector<8x1xf32> to vector<8x4xf32>
    %286 = arith.subf %282, %285 : vector<8x4xf32>
    %287 = math.exp %286 : vector<8x4xf32>
    %cst_67 = arith.constant dense<0.000000e+00> : vector<8xf32>
    %288 = vector.multi_reduction <add>, %287, %cst_67 [1] : vector<8x4xf32> to vector<8xf32>
    %289 = vector.shape_cast %288 : vector<8xf32> to vector<8x1xf32>
    %290 = math.log %289 : vector<8x1xf32>
    %291 = vector.broadcast %290 : vector<8x1xf32> to vector<8x4xf32>
    %292 = arith.subf %286, %291 : vector<8x4xf32>
    %c0_68 = arith.constant 0 : index
    %c0_69 = arith.constant 0 : index
    %293 = vector.load %arg8[%c0_68, %c0_69] : memref<8x4xf32, #tpu.memory_space<vmem>>, vector<8x4xf32>
    tpu.vector_store %arg8[%c0_68, %c0_69], %292 {strides = array<i32>} : memref<8x4xf32, #tpu.memory_space<vmem>>, vector<8x4xf32>,
    return
  }
  func.func @transform_0(%arg0: i32) -> (i32, i32) {
    %c0_i32 = arith.constant 0 : i32
    %c0_i32_0 = arith.constant 0 : i32
    %c0_i32_1 = arith.constant 0 : i32
    return %c0_i32, %c0_i32_0 : i32, i32
  }
  func.func @transform_1(%arg0: i32) -> (i32, i32) {
    %c0_i32 = arith.constant 0 : i32
    %c0_i32_0 = arith.constant 0 : i32
    %c0_i32_1 = arith.constant 0 : i32
    return %c0_i32, %c0_i32_0 : i32, i32
  }
  func.func @transform_2(%arg0: i32) -> (i32, i32) {
    %c0_i32 = arith.constant 0 : i32
    %c0_i32_0 = arith.constant 0 : i32
    %c0_i32_1 = arith.constant 0 : i32
    return %c0_i32, %c0_i32_0 : i32, i32
  }
  func.func @transform_3(%arg0: i32) -> (i32, i32) {
    %c0_i32 = arith.constant 0 : i32
    %c0_i32_0 = arith.constant 0 : i32
    %c0_i32_1 = arith.constant 0 : i32
    return %c0_i32, %c0_i32_0 : i32, i32
  }
  func.func @transform_4(%arg0: i32) -> (i32, i32) {
    %c0_i32 = arith.constant 0 : i32
    %c0_i32_0 = arith.constant 0 : i32
    %c0_i32_1 = arith.constant 0 : i32
    return %c0_i32, %c0_i32_0 : i32, i32
  }
  func.func @transform_5(%arg0: i32) -> (i32, i32) {
    %c0_i32 = arith.constant 0 : i32
    %c0_i32_0 = arith.constant 0 : i32
    %c0_i32_1 = arith.constant 0 : i32
    return %c0_i32, %c0_i32_0 : i32, i32
  }
  func.func @transform_6(%arg0: i32) -> (i32, i32) {
    %c0_i32 = arith.constant 0 : i32
    %c0_i32_0 = arith.constant 0 : i32
    %c0_i32_1 = arith.constant 0 : i32
    return %c0_i32, %c0_i32_0 : i32, i32
  }
  func.func @transform_7(%arg0: i32) -> (i32, i32) {
    %c0_i32 = arith.constant 0 : i32
    %c0_i32_0 = arith.constant 0 : i32
    %c0_i32_1 = arith.constant 0 : i32
    return %c0_i32, %c0_i32_0 : i32, i32
  }
}

</mosaic_0001>

<bundles_post_ra>
// kernel: gru_forward.1
= control target key start
LH: loop header
LB: loop body
LE: loop exit
PB: predicated region body
PF: predicated region fallthrough
CT: control target
= control target key end

     0   :  { %v1392_v0 = vmov 0.0   ;;  %vm1393_vm0 = vmmov 0   ;;  %vm43_vm1 = vcmask 130048   ;;  %s1394_s18 = smov 64   ;;  %vm173_vm2 = vcmask 785408   ;;  %s1707_s1 = inlined_call_operand.vmem [shape: f32[16,96], index: 1, kind: input, shape index: {}]   ;;  %s1708_s2 = inlined_call_operand.vmem [shape: f32[32,96], index: 2, kind: input, shape index: {}]   ;;  %s1709_s0 = inlined_call_operand.vmem [shape: f32[64,16], index: 0, kind: input, shape index: {}]   ;;  %s1710_s4 = inlined_call_operand.vmem [shape: f32[1,32], index: 4, kind: input, shape index: {}]   ;;  %s1711_s3 = inlined_call_operand.vmem [shape: f32[1,96], index: 3, kind: input, shape index: {}]   ;;  %s1712_s5 = inlined_call_operand.vmem [shape: f32[32,4], index: 5, kind: input, shape index: {}]   ;;  %s1713_s6 = inlined_call_operand.vmem [shape: f32[1,4], index: 6, kind: input, shape index: {}]   ;;  %s1714_s7 = inlined_call_operand.vmem [shape: f32[8,4], index: 7, kind: output, shape index: {}]  }
   0x1   :  { %1235 = vmatprep.subr.mxu1 %v1392_v0  ;;  %v35_v1 = vld [vmem:[%s1707_s1 + $0x8] sm:$0xff]  ;;  %v1443_v2 = vld [vmem:[%s1708_s2 + $0x18] sm:$0xff]  ;;  %v34_v3 = vld [vmem:[%s1707_s1] sm:$0xff]  ;;  %1243 = vmatprep.mubr.msk.f32.mxu1 %vm1393_vm0, %v1392_v0  ;;  %vm192_vm3 = vcmask 261120   ;;  %vm1119_vm4 = vcmask 31744  }
   0x2   :  { %1219 = vmatprep.subr.mxu0 %v35_v1  ;;  %1236 = vmatpush3.msra.mxu1 %v1443_v2  ;;  %v1454_v4 = vld [vmem:[%s1708_s2 + $0x10] sm:$0xff]  ;;  %v26_v5 = vld [vmem:[%s1709_s0] sm:$0xff]  ;;  %v27_v6 = vld [vmem:[%s1709_s0 + $0x8] sm:$0xff] }
   0x3   :  { %1220 = vmatpush3.msra.mxu0 %v35_v1  ;;  %1237 = vmatprep.subr.mxu1 %v1392_v0  ;;  %v1467_v7 = vld [vmem:[%s1708_s2 + $0x8] sm:$0xff]  ;;  %v1146_v8 = vld [vmem:[%s1710_s4] ss:$0 sm:$0xff]  ;;  %v28_v49 = vld [vmem:[%s1709_s0 + $0x10] sm:$0xff] }
   0x4   :  { %1221 = vmatprep.subr.mxu0 %v34_v3  ;;  %1238 = vmatpush3.msra.mxu1 %v1454_v4  ;;  %v1478_v9 = vld [vmem:[%s1708_s2] sm:$0xff]  ;;  %v29_v50 = vld [vmem:[%s1709_s0 + $0x18] sm:$0xff]  ;;  %v31_v52 = vld [vmem:[%s1709_s0 + $0x28] sm:$0xff] }
   0x5   :  { %1222 = vmatpush3.msra.mxu0 %v34_v3  ;;  %1223 = vmatprep.mubr.msk.f32.mxu0 %vm43_vm1, %v26_v5  ;;  %v1508_v11 = vld [vmem:[%s1711_s3] ss:$0 sm:$0xff]  ;;  %s1395_s3 = smov 96   ;;  %v32_v53 = vld [vmem:[%s1709_s0 + $0x30] sm:$0xff]  ;;  %v33_v54 = vld [vmem:[%s1709_s0 + $0x38] sm:$0xff] }
   0x6   :  { %1239 = vmatprep.subr.mxu1 %v1392_v0  ;;  %1224 = vmatmul.mubr.msk.f32.vlgmr.msra.gmra.mxu0 %vm43_vm1, %v27_v6  ;;  %v30_v51 = vld [vmem:[%s1709_s0 + $0x20] sm:$0xff] }
   0x7   :  { %1240 = vmatpush3.msra.mxu1 %v1467_v7  ;;  %274 = vrot.lane.b32.xlu0 %v1146_v8, %s1394_s18 }
   0x8   :  { %1241 = vmatprep.subr.mxu1 %v1392_v0  ;;  %1257 = vmatprep.subr.mxu0 %v1392_v0 }
   0x9   :  { %1242 = vmatpush3.msra.mxu1 %v1478_v9  ;;  %1258 = vmatpush3.msra.mxu0 %v1443_v2 }
   0xa   :  { %1244 = vmatmul.mubr.f32.vlgmr.msra.gmra.mxu1 %v1392_v0  ;;  %1246 = vmatprep.subr.mxu1 %v1392_v0 }
   0xb   :  { %1247 = vmatpush3.msra.mxu1 %v1443_v2  ;;  %1254 = vmatprep.mubr.msk.f32.mxu1 %vm1393_vm0, %v1392_v0 }
   0xc   :  { %1248 = vmatprep.subr.mxu1 %v1392_v0  ;;  %1259 = vmatprep.subr.mxu0 %v1392_v0 }
   0xd   :  { %1249 = vmatpush3.msra.mxu1 %v1454_v4  ;;  %1260 = vmatpush3.msra.mxu0 %v1454_v4 }
   0xe   :  { %1250 = vmatprep.subr.mxu1 %v1392_v0  ;;  %1261 = vmatprep.subr.mxu0 %v1392_v0 }
   0xf   :  { %1251 = vmatpush3.msra.mxu1 %v1467_v7  ;;  %1262 = vmatpush3.msra.mxu0 %v1467_v7 }
  0x10   :  { %1252 = vmatprep.subr.mxu1 %v1392_v0  ;;  %1263 = vmatprep.subr.mxu0 %v1392_v0 }
  0x11   :  { %1253 = vmatpush3.msra.mxu1 %v1478_v9  ;;  %1264 = vmatpush3.msra.mxu0 %v1478_v9 }
  0x12   :  { %1268 = vmatprep.subr.mxu1 %v1392_v0  ;;  %1279 = vmatprep.subr.mxu0 %v1392_v0 }
  0x13   :  { %1226 = vmatprep.mubr.msk.f32.mxu0 %vm43_vm1, %v28_v49 }
  0x14   :  { %1227 = vmatmul.mubr.msk.f32.gmra.mxu0 %vm43_vm1, %v29_v50 }
  0x15   :  { %1229 = vmatprep.mubr.msk.f32.mxu0 %vm43_vm1, %v30_v51 }
  0x18   :  { %1230 = vmatmul.mubr.msk.f32.gmra.mxu0 %vm43_vm1, %v31_v52 }
  0x19   :  { %1232 = vmatprep.mubr.msk.f32.mxu0 %vm43_vm1, %v32_v53 }
  0x1c   :  { %1233 = vmatmul.mubr.msk.f32.gmra.mxu0 %vm43_vm1, %v33_v54 }
  0x1d   :  { %1265 = vmatprep.mubr.msk.f32.mxu0 %vm1393_vm0, %v1392_v0 }
  0x79   :  { %v1511_v14 = vpop.permute.xlu0 %274 }
  0xc6   :  { %v1225_v10 = vpop.f32.mrf.mxu0 }
  0xc7   :  { %v140_v12 = vadd.f32 %v1225_v10, %v1508_v11 }
  0xc8   :  { %v134_v13 = vpop.f32.mrf.mxu0 }
  0xc9   :  { %175 = vst.msk [vmem:[#allocation2 + $0x8] sm:$0xff] %vm173_vm2, %v140_v12  ;;  %v135_v15 = vadd.f32 %v1508_v11, %v134_v13 }
  0xca   :  { %v262_v16 = vpop.f32.mrf.mxu1 }
  0xcb   :  { %174 = vst.msk [vmem:[#allocation2] sm:$0xff] %vm173_vm2, %v135_v15  ;;  %v277_v17 = vadd.f32 %v1511_v14, %v262_v16 }
  0xcc   :  { %v1245_v18 = vpop.f32.mrf.mxu1 }
  0xcd   :  { %279 = vrot.lane.b32.xlu0 %v277_v17, %s1394_s18 }
  0xd0   :  { %v373_v39 = vld [vmem:[#allocation2 + $0x8] sm:$0xff] }
  0xd2   :  { %v266_v19 = vld [vmem:[#allocation2] sm:$0xff] }
  0xd3   :  { %v267_v20 = vadd.f32 %v266_v19, %v262_v16 }
  0xd4   :  { %v1228_v61 = vpop.f32.mrf.mxu0 }
  0xd5   :  { %v1147_v21 = vmul.f32 -1.442695, %v267_v20  ;;  %v150_v62 = vadd.f32 %v1228_v61, %v1508_v11 }
  0xd6   :  { %v144_v63 = vpop.f32.mrf.mxu0 }
  0xd7   :  { %1338 = vpow2.f32 %v1147_v21  ;;  %177 = vst.msk [vmem:[#allocation2 + $0x18] sm:$0xff] %vm173_vm2, %v150_v62  ;;  %v145_v1 = vadd.f32 %v1508_v11, %v144_v63 }
  0xd8   :  { %v1231_v3 = vpop.f32.mrf.mxu0 }
  0xd9   :  { %176 = vst.msk [vmem:[#allocation2 + $0x10] sm:$0xff] %vm173_vm2, %v145_v1  ;;  %v160_v5 = vadd.f32 %v1231_v3, %v1508_v11 }
  0xda   :  { %v154_v6 = vpop.f32.mrf.mxu0 }
  0xdb   :  { %179 = vst.msk [vmem:[#allocation2 + $0x28] sm:$0xff] %vm173_vm2, %v160_v5  ;;  %v155_v8 = vadd.f32 %v1508_v11, %v154_v6 }
  0xdc   :  { %v1234_v10 = vpop.f32.mrf.mxu0 }
  0xdd   :  { %178 = vst.msk [vmem:[#allocation2 + $0x20] sm:$0xff] %vm173_vm2, %v155_v8  ;;  %v170_v12 = vadd.f32 %v1234_v10, %v1508_v11 }
  0xde   :  { %v164_v13 = vpop.f32.mrf.mxu0 }
  0xdf   :  { %181 = vst.msk [vmem:[#allocation2 + $0x38] sm:$0xff] %vm173_vm2, %v170_v12  ;;  %v165_v15 = vadd.f32 %v1508_v11, %v164_v13 }
  0xe1   :  { %180 = vst.msk [vmem:[#allocation2 + $0x30] sm:$0xff] %vm173_vm2, %v165_v15 }
  0xe4   :  { %v1339_v22 = vpop.eup %1338  ;;  %v688_v61 = vld [vmem:[#allocation2 + $0x20] sm:$0xff] }
  0xe5   :  { %v271_v23 = vadd.f32 1.0, %v1339_v22 }
  0xe7   :  { %1340 = vrcp.f32 %v271_v23 }
  0xf4   :  { %v1341_v24 = vpop.eup %1340 }
  0xf5   :  { %v289_v30 = vsub.f32 1.0, %v1341_v24  ;;  %v295_v32 = vmul.f32 0.0, %v1341_v24 }
 0x13f   :  { %v280_v25 = vpop.permute.xlu0 %279 }
 0x140   :  { %v282_v26 = vmul.f32 %v1341_v24, %v280_v25 }
 0x142   :  { %284 = vrot.lane.b32.xlu1 %v282_v26, %s1394_s18 }
 0x1b4   :  { %v285_v27 = vpop.permute.xlu1 %284 }
 0x1b5   :  { %v287_v28 = vadd.f32 %v285_v27, %v266_v19  ;;  %v478_v19 = vld [vmem:[#allocation2 + $0x10] sm:$0xff] }
 0x1b7   :  { %1342 = vtanh.f32 %v287_v28 }
 0x1c4   :  { %v1343_v29 = vpop.eup %1342 }
 0x1c5   :  { %291 = vrot.lane.b32.xlu1 %v1343_v29, %s1395_s3 }
 0x237   :  { %v292_v31 = vpop.permute.xlu1 %291 }
 0x238   :  { %v294_v33 = vmul.f32 %v292_v31, %v289_v30 }
 0x23a   :  { %v1520_v34 = vadd.f32 %v295_v32, %v294_v33 }
 0x23c   :  { %298 = vrot.lane.b32.xlu0 %v1520_v34, %s1395_s3 }
 0x2ae   :  { %v299_v35 = vpop.permute.xlu0 %298 }
 0x2af   :  { %1255 = vmatmul.mubr.msk.f32.vlgmr.msra.gmra.mxu1 %vm192_vm3, %v299_v35 }
 0x2b0   :  { %1269 = vmatpush3.msra.mxu1 %v1443_v2  ;;  %1276 = vmatprep.mubr.msk.f32.mxu1 %vm1393_vm0, %v1392_v0 }
 0x2b1   :  { %1270 = vmatprep.subr.mxu1 %v1392_v0 }
 0x2b2   :  { %1271 = vmatpush3.msra.mxu1 %v1454_v4 }
 0x2b3   :  { %1272 = vmatprep.subr.mxu1 %v1392_v0 }
 0x2b4   :  { %1273 = vmatpush3.msra.mxu1 %v1467_v7 }
 0x2b5   :  { %1274 = vmatprep.subr.mxu1 %v1392_v0 }
 0x2b6   :  { %1275 = vmatpush3.msra.mxu1 %v1478_v9 }
 0x2b7   :  { %1290 = vmatprep.subr.mxu1 %v1392_v0 }
 0x36f   :  { %v368_v36 = vpop.f32.mrf.mxu1 }
 0x370   :  { %v381_v37 = vadd.f32 %v368_v36, %v1511_v14  ;;  %v374_v40 = vadd.f32 %v373_v39, %v368_v36 }
 0x371   :  { %v1256_v38 = vpop.f32.mrf.mxu1 }
 0x372   :  { %383 = vrot.lane.b32.xlu1 %v381_v37, %s1394_s18  ;;  %v1149_v41 = vmul.f32 -1.442695, %v374_v40  ;;  %v583_v40 = vld [vmem:[#allocation2 + $0x18] sm:$0xff] }
 0x374   :  { %1344 = vpow2.f32 %v1149_v41 }
 0x381   :  { %v1345_v42 = vpop.eup %1344 }
 0x382   :  { %v378_v43 = vadd.f32 1.0, %v1345_v42 }
 0x384   :  { %1346 = vrcp.f32 %v378_v43 }
 0x391   :  { %v1347_v44 = vpop.eup %1346 }
 0x392   :  { %v393_v56 = vsub.f32 1.0, %v1347_v44  ;;  %v399_v58 = vmul.f32 %v1347_v44, %v1520_v34 }
 0x3e4   :  { %v384_v45 = vpop.permute.xlu1 %383 }
 0x3e5   :  { %v386_v46 = vmul.f32 %v1347_v44, %v384_v45 }
 0x3e7   :  { %388 = vrot.lane.b32.xlu0 %v386_v46, %s1394_s18 }
 0x459   :  { %v389_v47 = vpop.permute.xlu0 %388 }
 0x45a   :  { %v391_v48 = vadd.f32 %v389_v47, %v373_v39 }
 0x45c   :  { %1348 = vtanh.f32 %v391_v48 }
 0x469   :  { %v1349_v55 = vpop.eup %1348 }
 0x46a   :  { %395 = vrot.lane.b32.xlu1 %v1349_v55, %s1395_s3 }
 0x4dc   :  { %v396_v57 = vpop.permute.xlu1 %395 }
 0x4dd   :  { %v398_v59 = vmul.f32 %v396_v57, %v393_v56 }
 0x4df   :  { %v1566_v60 = vadd.f32 %v399_v58, %v398_v59 }
 0x4e1   :  { %403 = vrot.lane.b32.xlu0 %v1566_v60, %s1395_s3 }
 0x553   :  { %v404_v16 = vpop.permute.xlu0 %403 }
 0x554   :  { %1266 = vmatmul.mubr.msk.f32.vlgmr.msra.gmra.mxu0 %vm192_vm3, %v404_v16 }
 0x555   :  { %1280 = vmatpush3.msra.mxu0 %v1443_v2  ;;  %1287 = vmatprep.mubr.msk.f32.mxu0 %vm1393_vm0, %v1392_v0 }
 0x556   :  { %1281 = vmatprep.subr.mxu0 %v1392_v0 }
 0x557   :  { %1282 = vmatpush3.msra.mxu0 %v1454_v4 }
 0x558   :  { %1283 = vmatprep.subr.mxu0 %v1392_v0 }
 0x559   :  { %1284 = vmatpush3.msra.mxu0 %v1467_v7 }
 0x55a   :  { %1285 = vmatprep.subr.mxu0 %v1392_v0 }
 0x55b   :  { %1286 = vmatpush3.msra.mxu0 %v1478_v9 }
 0x55c   :  { %1301 = vmatprep.subr.mxu0 %v1392_v0 }
 0x614   :  { %v473_v11 = vpop.f32.mrf.mxu0 }
 0x615   :  { %v486_v17 = vadd.f32 %v473_v11, %v1511_v14  ;;  %v479_v20 = vadd.f32 %v478_v19, %v473_v11 }
 0x616   :  { %v1267_v18 = vpop.f32.mrf.mxu0 }
 0x617   :  { %488 = vrot.lane.b32.xlu1 %v486_v17, %s1394_s18  ;;  %v1151_v21 = vmul.f32 -1.442695, %v479_v20 }
 0x619   :  { %1350 = vpow2.f32 %v1151_v21 }
 0x626   :  { %v1351_v22 = vpop.eup %1350 }
 0x627   :  { %v483_v23 = vadd.f32 1.0, %v1351_v22 }
 0x629   :  { %1352 = vrcp.f32 %v483_v23 }
 0x636   :  { %v1353_v24 = vpop.eup %1352 }
 0x637   :  { %v498_v30 = vsub.f32 1.0, %v1353_v24  ;;  %v504_v32 = vmul.f32 %v1353_v24, %v1566_v60 }
 0x689   :  { %v489_v25 = vpop.permute.xlu1 %488 }
 0x68a   :  { %v491_v26 = vmul.f32 %v1353_v24, %v489_v25 }
 0x68c   :  { %493 = vrot.lane.b32.xlu0 %v491_v26, %s1394_s18 }
 0x6fe   :  { %v494_v27 = vpop.permute.xlu0 %493 }
 0x6ff   :  { %v496_v28 = vadd.f32 %v494_v27, %v478_v19 }
 0x701   :  { %1354 = vtanh.f32 %v496_v28 }
 0x70e   :  { %v1355_v29 = vpop.eup %1354 }
 0x70f   :  { %500 = vrot.lane.b32.xlu1 %v1355_v29, %s1395_s3 }
 0x781   :  { %v501_v31 = vpop.permute.xlu1 %500 }
 0x782   :  { %v503_v33 = vmul.f32 %v501_v31, %v498_v30 }
 0x784   :  { %v1598_v35 = vadd.f32 %v504_v32, %v503_v33 }
 0x786   :  { %508 = vrot.lane.b32.xlu0 %v1598_v35, %s1395_s3 }
 0x7f8   :  { %v509_v36 = vpop.permute.xlu0 %508 }
 0x7f9   :  { %1277 = vmatmul.mubr.msk.f32.vlgmr.msra.gmra.mxu1 %vm192_vm3, %v509_v36 }
 0x7fa   :  { %1291 = vmatpush3.msra.mxu1 %v1443_v2  ;;  %1298 = vmatprep.mubr.msk.f32.mxu1 %vm1393_vm0, %v1392_v0 }
 0x7fb   :  { %1292 = vmatprep.subr.mxu1 %v1392_v0 }
 0x7fc   :  { %1293 = vmatpush3.msra.mxu1 %v1454_v4 }
 0x7fd   :  { %1294 = vmatprep.subr.mxu1 %v1392_v0 }
 0x7fe   :  { %1295 = vmatpush3.msra.mxu1 %v1467_v7 }
 0x7ff   :  { %1296 = vmatprep.subr.mxu1 %v1392_v0 }
 0x800   :  { %1297 = vmatpush3.msra.mxu1 %v1478_v9 }
 0x801   :  { %1312 = vmatprep.subr.mxu1 %v1392_v0 }
 0x8b9   :  { %v578_v37 = vpop.f32.mrf.mxu1 }
 0x8ba   :  { %v591_v38 = vadd.f32 %v578_v37, %v1511_v14  ;;  %v584_v41 = vadd.f32 %v583_v40, %v578_v37 }
 0x8bb   :  { %v1278_v39 = vpop.f32.mrf.mxu1 }
 0x8bc   :  { %593 = vrot.lane.b32.xlu1 %v591_v38, %s1394_s18  ;;  %v1153_v42 = vmul.f32 -1.442695, %v584_v41  ;;  %v898_v41 = vld [vmem:[#allocation2 + $0x30] sm:$0xff] }
 0x8be   :  { %1356 = vpow2.f32 %v1153_v42 }
 0x8cb   :  { %v1357_v43 = vpop.eup %1356 }
 0x8cc   :  { %v588_v44 = vadd.f32 1.0, %v1357_v43 }
 0x8ce   :  { %1358 = vrcp.f32 %v588_v44 }
 0x8db   :  { %v1359_v45 = vpop.eup %1358 }
 0x8dc   :  { %v603_v51 = vsub.f32 1.0, %v1359_v45  ;;  %v609_v53 = vmul.f32 %v1359_v45, %v1598_v35 }
 0x92e   :  { %v594_v46 = vpop.permute.xlu1 %593 }
 0x92f   :  { %v596_v47 = vmul.f32 %v1359_v45, %v594_v46 }
 0x931   :  { %598 = vrot.lane.b32.xlu0 %v596_v47, %s1394_s18 }
 0x9a3   :  { %v599_v48 = vpop.permute.xlu0 %598 }
 0x9a4   :  { %v601_v49 = vadd.f32 %v599_v48, %v583_v40 }
 0x9a6   :  { %1360 = vtanh.f32 %v601_v49 }
 0x9b3   :  { %v1361_v50 = vpop.eup %1360 }
 0x9b4   :  { %605 = vrot.lane.b32.xlu1 %v1361_v50, %s1395_s3 }
 0xa26   :  { %v606_v52 = vpop.permute.xlu1 %605 }
 0xa27   :  { %v608_v54 = vmul.f32 %v606_v52, %v603_v51 }
 0xa29   :  { %v1618_v55 = vadd.f32 %v609_v53, %v608_v54 }
 0xa2b   :  { %613 = vrot.lane.b32.xlu0 %v1618_v55, %s1395_s3 }
 0xa9d   :  { %v614_v56 = vpop.permute.xlu0 %613 }
 0xa9e   :  { %1288 = vmatmul.mubr.msk.f32.vlgmr.msra.gmra.mxu0 %vm192_vm3, %v614_v56 }
 0xa9f   :  { %1302 = vmatpush3.msra.mxu0 %v1443_v2  ;;  %1309 = vmatprep.mubr.msk.f32.mxu0 %vm1393_vm0, %v1392_v0 }
 0xaa0   :  { %1303 = vmatprep.subr.mxu0 %v1392_v0 }
 0xaa1   :  { %1304 = vmatpush3.msra.mxu0 %v1454_v4 }
 0xaa2   :  { %1305 = vmatprep.subr.mxu0 %v1392_v0 }
 0xaa3   :  { %1306 = vmatpush3.msra.mxu0 %v1467_v7 }
 0xaa4   :  { %1307 = vmatprep.subr.mxu0 %v1392_v0 }
 0xaa5   :  { %1308 = vmatpush3.msra.mxu0 %v1478_v9 }
 0xaa6   :  { %1323 = vmatprep.subr.mxu0 %v1392_v0 }
 0xb5e   :  { %v683_v57 = vpop.f32.mrf.mxu0 }
 0xb5f   :  { %v696_v58 = vadd.f32 %v683_v57, %v1511_v14  ;;  %v689_v62 = vadd.f32 %v688_v61, %v683_v57 }
 0xb60   :  { %v1289_v59 = vpop.f32.mrf.mxu0 }
 0xb61   :  { %698 = vrot.lane.b32.xlu1 %v696_v58, %s1394_s18  ;;  %v1155_v63 = vmul.f32 -1.442695, %v689_v62 }
 0xb63   :  { %1362 = vpow2.f32 %v1155_v63  ;;  %v1003_v63 = vld [vmem:[#allocation2 + $0x38] sm:$0xff] }
 0xb70   :  { %v1363_v1 = vpop.eup %1362 }
 0xb71   :  { %v693_v3 = vadd.f32 1.0, %v1363_v1 }
 0xb73   :  { %1364 = vrcp.f32 %v693_v3 }
 0xb80   :  { %v1365_v5 = vpop.eup %1364 }
 0xb81   :  { %v708_v15 = vsub.f32 1.0, %v1365_v5  ;;  %v714_v11 = vmul.f32 %v1365_v5, %v1618_v55 }
 0xbd3   :  { %v699_v6 = vpop.permute.xlu1 %698 }
 0xbd4   :  { %v701_v8 = vmul.f32 %v1365_v5, %v699_v6 }
 0xbd6   :  { %703 = vrot.lane.b32.xlu0 %v701_v8, %s1394_s18 }
 0xc48   :  { %v704_v10 = vpop.permute.xlu0 %703 }
 0xc49   :  { %v706_v12 = vadd.f32 %v704_v10, %v688_v61 }
 0xc4b   :  { %1366 = vtanh.f32 %v706_v12 }
 0xc58   :  { %v1367_v13 = vpop.eup %1366 }
 0xc59   :  { %710 = vrot.lane.b32.xlu1 %v1367_v13, %s1395_s3 }
 0xccb   :  { %v711_v16 = vpop.permute.xlu1 %710 }
 0xccc   :  { %v713_v17 = vmul.f32 %v711_v16, %v708_v15 }
 0xcce   :  { %v1638_v18 = vadd.f32 %v714_v11, %v713_v17  ;;  %v1035_v11 = vld [vmem:[%s1712_s5 + $0x10] sm:$0xff]  ;;  %v1034_v17 = vld [vmem:[%s1712_s5 + $0x8] sm:$0xff] }
 0xcd0   :  { %718 = vrot.lane.b32.xlu0 %v1638_v18, %s1395_s3 }
 0xd42   :  { %v719_v19 = vpop.permute.xlu0 %718 }
 0xd43   :  { %1299 = vmatmul.mubr.msk.f32.vlgmr.msra.gmra.mxu1 %vm192_vm3, %v719_v19  ;;  %v1033_v19 = vld [vmem:[%s1712_s5] sm:$0xff] }
 0xd44   :  { %1313 = vmatpush3.msra.mxu1 %v1443_v2  ;;  %1320 = vmatprep.mubr.msk.f32.mxu1 %vm1393_vm0, %v1392_v0  ;;  %v793_v2 = vld [vmem:[#allocation2 + $0x28] sm:$0xff] }
 0xd45   :  { %1314 = vmatprep.subr.mxu1 %v1392_v0 }
 0xd46   :  { %1315 = vmatpush3.msra.mxu1 %v1454_v4 }
 0xd47   :  { %1316 = vmatprep.subr.mxu1 %v1392_v0 }
 0xd48   :  { %1317 = vmatpush3.msra.mxu1 %v1467_v7 }
 0xd49   :  { %1318 = vmatprep.subr.mxu1 %v1392_v0 }
 0xd4a   :  { %1319 = vmatpush3.msra.mxu1 %v1478_v9 }
 0xe03   :  { %v788_v20 = vpop.f32.mrf.mxu1 }
 0xe04   :  { %v801_v21 = vadd.f32 %v788_v20, %v1511_v14  ;;  %v794_v23 = vadd.f32 %v793_v2, %v788_v20  ;;  %v401_v20 = vmax.f32 %v1520_v34, %v1566_v60  ;;  %v1162_v60 = vld [vmem:[%s1713_s6] ss:$0 sm:$0xff] }
 0xe05   :  { %v1300_v22 = vpop.f32.mrf.mxu1 }
 0xe06   :  { %803 = vrot.lane.b32.xlu1 %v801_v21, %s1394_s18  ;;  %v1157_v24 = vmul.f32 -1.442695, %v794_v23  ;;  %v506_v21 = vmax.f32 %v401_v20, %v1598_v35 }
 0xe08   :  { %1368 = vpow2.f32 %v1157_v24  ;;  %v611_v22 = vmax.f32 %v506_v21, %v1618_v55 }
 0xe15   :  { %v1369_v25 = vpop.eup %1368 }
 0xe16   :  { %v798_v4 = vadd.f32 1.0, %v1369_v25 }
 0xe18   :  { %1370 = vrcp.f32 %v798_v4 }
 0xe25   :  { %v1371_v26 = vpop.eup %1370 }
 0xe26   :  { %v813_v30 = vsub.f32 1.0, %v1371_v26  ;;  %v819_v32 = vmul.f32 %v1371_v26, %v1638_v18 }
 0xe78   :  { %v804_v27 = vpop.permute.xlu1 %803 }
 0xe79   :  { %v806_v7 = vmul.f32 %v1371_v26, %v804_v27 }
 0xe7b   :  { %808 = vrot.lane.b32.xlu0 %v806_v7, %s1394_s18 }
 0xeed   :  { %v809_v28 = vpop.permute.xlu0 %808 }
 0xeee   :  { %v811_v9 = vadd.f32 %v809_v28, %v793_v2  ;;  %v716_v2 = vmax.f32 %v611_v22, %v1638_v18 }
 0xef0   :  { %1372 = vtanh.f32 %v811_v9 }
 0xefd   :  { %v1373_v29 = vpop.eup %1372 }
 0xefe   :  { %815 = vrot.lane.b32.xlu1 %v1373_v29, %s1395_s3 }
 0xf70   :  { %v816_v31 = vpop.permute.xlu1 %815 }
 0xf71   :  { %v818_v33 = vmul.f32 %v816_v31, %v813_v30 }
 0xf73   :  { %v1657_v36 = vadd.f32 %v819_v32, %v818_v33 }
 0xf75   :  { %823 = vrot.lane.b32.xlu0 %v1657_v36, %s1395_s3  ;;  %v821_v25 = vmax.f32 %v716_v2, %v1657_v36 }
 0xfe7   :  { %v824_v37 = vpop.permute.xlu0 %823 }
 0xfe8   :  { %1310 = vmatmul.mubr.msk.f32.vlgmr.msra.gmra.mxu0 %vm192_vm3, %v824_v37 }
 0xfe9   :  { %1331 = vmatprep.mubr.msk.f32.mxu0 %vm1393_vm0, %v1392_v0 }
0x10a8   :  { %v893_v38 = vpop.f32.mrf.mxu0 }
0x10a9   :  { %v906_v39 = vadd.f32 %v893_v38, %v1511_v14  ;;  %v899_v42 = vadd.f32 %v898_v41, %v893_v38 }
0x10aa   :  { %v1311_v40 = vpop.f32.mrf.mxu0 }
0x10ab   :  { %908 = vrot.lane.b32.xlu1 %v906_v39, %s1394_s18  ;;  %v1159_v43 = vmul.f32 -1.442695, %v899_v42 }
0x10ad   :  { %1374 = vpow2.f32 %v1159_v43 }
0x10ba   :  { %v1375_v44 = vpop.eup %1374 }
0x10bb   :  { %v903_v45 = vadd.f32 1.0, %v1375_v44 }
0x10bd   :  { %1376 = vrcp.f32 %v903_v45 }
0x10ca   :  { %v1377_v46 = vpop.eup %1376 }
0x10cb   :  { %v918_v52 = vsub.f32 1.0, %v1377_v46  ;;  %v924_v54 = vmul.f32 %v1377_v46, %v1657_v36 }
0x111d   :  { %v909_v47 = vpop.permute.xlu1 %908 }
0x111e   :  { %v911_v48 = vmul.f32 %v1377_v46, %v909_v47 }
0x1120   :  { %913 = vrot.lane.b32.xlu0 %v911_v48, %s1394_s18 }
0x1192   :  { %v914_v49 = vpop.permute.xlu0 %913 }
0x1193   :  { %v916_v50 = vadd.f32 %v914_v49, %v898_v41 }
0x1195   :  { %1378 = vtanh.f32 %v916_v50 }
0x11a2   :  { %v1379_v51 = vpop.eup %1378 }
0x11a3   :  { %920 = vrot.lane.b32.xlu1 %v1379_v51, %s1395_s3 }
0x1215   :  { %v921_v53 = vpop.permute.xlu1 %920 }
0x1216   :  { %v923_v56 = vmul.f32 %v921_v53, %v918_v52 }
0x1218   :  { %v925_v57 = vadd.f32 %v924_v54, %v923_v56 }
0x121a   :  { %928 = vrot.lane.b32.xlu0 %v925_v57, %s1395_s3  ;;  %v926_v27 = vmax.f32 %v821_v25, %v925_v57 }
0x128c   :  { %v929_v58 = vpop.permute.xlu0 %928 }
0x128d   :  { %1321 = vmatmul.mubr.msk.f32.vlgmr.msra.gmra.mxu1 %vm192_vm3, %v929_v58 }
0x134d   :  { %v998_v59 = vpop.f32.mrf.mxu1 }
0x134e   :  { %v1011_v61 = vadd.f32 %v998_v59, %v1511_v14  ;;  %v1004_v1 = vadd.f32 %v1003_v63, %v998_v59  ;;  %v1036_v14 = vld [vmem:[%s1712_s5 + $0x18] sm:$0xff] }
0x134f   :  { %v1322_v62 = vpop.f32.mrf.mxu1  ;;  %1324 = vmatpush3.msra.mxu0 %v1036_v14 }
0x1350   :  { %1013 = vrot.lane.b32.xlu1 %v1011_v61, %s1394_s18  ;;  %v1161_v3 = vmul.f32 -1.442695, %v1004_v1  ;;  %1325 = vmatprep.subr.mxu0 %v1392_v0 }
0x1351   :  { %1326 = vmatpush3.msra.mxu0 %v1035_v11 }
0x1352   :  { %1380 = vpow2.f32 %v1161_v3  ;;  %1327 = vmatprep.subr.mxu0 %v1392_v0 }
0x1353   :  { %1328 = vmatpush3.msra.mxu0 %v1034_v17 }
0x1354   :  { %1329 = vmatprep.subr.mxu0 %v1392_v0 }
0x1355   :  { %1330 = vmatpush3.msra.mxu0 %v1033_v19 }
0x135f   :  { %v1381_v5 = vpop.eup %1380 }
0x1360   :  { %v1008_v6 = vadd.f32 1.0, %v1381_v5 }
0x1362   :  { %1382 = vrcp.f32 %v1008_v6 }
0x136f   :  { %v1383_v8 = vpop.eup %1382 }
0x1370   :  { %v1023_v23 = vsub.f32 1.0, %v1383_v8  ;;  %v1029_v4 = vmul.f32 %v1383_v8, %v925_v57 }
0x13c2   :  { %v1014_v10 = vpop.permute.xlu1 %1013 }
0x13c3   :  { %v1016_v12 = vmul.f32 %v1383_v8, %v1014_v10 }
0x13c5   :  { %1018 = vrot.lane.b32.xlu0 %v1016_v12, %s1394_s18 }
0x1437   :  { %v1019_v13 = vpop.permute.xlu0 %1018 }
0x1438   :  { %v1021_v15 = vadd.f32 %v1019_v13, %v1003_v63 }
0x143a   :  { %1384 = vtanh.f32 %v1021_v15 }
0x1447   :  { %v1385_v16 = vpop.eup %1384 }
0x1448   :  { %1025 = vrot.lane.b32.xlu1 %v1385_v16, %s1395_s3 }
0x14ba   :  { %v1026_v24 = vpop.permute.xlu1 %1025 }
0x14bb   :  { %v1028_v26 = vmul.f32 %v1026_v24, %v1023_v23 }
0x14bd   :  { %v1030_v7 = vadd.f32 %v1029_v4, %v1028_v26 }
0x14bf   :  { %v1031_v28 = vmax.f32 %v926_v27, %v1030_v7 }
0x14c1   :  { %1386 = vtanh.f32 %v1031_v28 }
0x14ce   :  { %v1387_v0 = vpop.eup %1386 }
0x14cf   :  { %1045 = vrot.lane.b32.xlu0 %v1387_v0, %s1395_s3 }
0x1541   :  { %v1046_v34 = vpop.permute.xlu0 %1045 }
0x1542   :  { %1332 = vmatmul.mubr.msk.f32.vlgmr.msra.gmra.mxu0 %vm192_vm3, %v1046_v34 }
0x1602   :  { %v1115_v35 = vpop.f32.mrf.mxu0 }
0x1603   :  { %v1116_v55 = vadd.f32 %v1162_v60, %v1115_v35 }
0x1604   :  { %v1333_v18 = vpop.f32.mrf.mxu0 }
0x1605   :  { %v1120_v9 = vsel %vm1119_vm4, %v1116_v55, -inf }
0x1606   :  { %1121 = vmax.xlane.f32.xlu1 %v1120_v9 }
0x168f   :  { %v1122_v29 = vpop.xlane.xlu1 %1121 }
0x1690   :  { %v1123_v30 = vsub.f32 %v1116_v55, %v1122_v29 }
0x1692   :  { %v1124_v31 = vmul.f32 1.442695, %v1123_v30 }
0x1694   :  { %1388 = vpow2.f32 %v1124_v31 }
0x16a1   :  { %v1389_v32 = vpop.eup %1388 }
0x16a2   :  { %v1126_v33 = vsel %vm1119_vm4, %v1389_v32, 0.0 }
0x16a3   :  { %1127 = vadd.xlane.f32.xlu0 %v1126_v33 }
0x172c   :  { %v1128_v36 = vpop.xlane.xlu0 %1127 }
0x172d   :  { %1390 = vlog2.f32 %v1128_v36 }
0x173a   :  { %v1391_v37 = vpop.eup %1390 }
0x173b   :  { %v1130_v38 = vmul.f32 0.6931472, %v1391_v37 }
0x173d   :  { %v1131_v39 = vsub.f32 %v1123_v30, %v1130_v38 }
0x173f   :  { %1132 = vst.msk [vmem:[%s1714_s7] sm:$0xff] %vm1119_vm4, %v1131_v39 }

</bundles_post_ra>
